<compile_context>
chip_gen: v7x
topology: tpu7x:2x2x1
jax: 0.10.0
libtpu: 0.0.40
codegen_flags: <defaults>
</compile_context>

<pallas_src>
import functools

import jax
import jax.numpy as jnp
from jax.experimental import pallas as pl
from jax.experimental.pallas import tpu as pltpu


def _conv2d_same_kernel(x_ref, w_ref, b_ref, o_ref, col_ref, *, kh, kw, sh, sw):
    """One (batch-tile, Ho-tile) step of a 'same'-padded conv, channels-last.

    x_ref  : (TN, Hp, Wp, Cin)         zero-padded input tile (resident across Ho tiles)
    w_ref  : (KH*KW*Cin, CoutP)        tap-folded weight (resident across the grid)
    b_ref  : (1, CoutP) float32        bias (zeros if the module had bias=None)
    o_ref  : (TN, THo, Wo, CoutP)      output tile
    col_ref: (TN, THo, Wo, KH*KW*Cin)  im2col scratch slab
    """
    tn, tho, wo, coutp = o_ref.shape
    cin = x_ref.shape[-1]
    k_total = kh * kw * cin
    rows = tn * tho * wo

    # First padded-input row used by this Ho tile.
    row0 = pl.multiple_of(pl.program_id(1) * (tho * sh), tho * sh)

    # im2col over the KH*KW taps: each tap is a (strided) ref slice copied straight into
    # the col slab.  This folds the taps into a single fat MXU contraction instead of
    # KH*KW skinny matmuls and avoids any live f32 accumulator across unrolled taps.
    # (For stride>1 the W slices are sublane-strided reads; a per-phase pre-split would
    # shave some XLU work but is not needed for correctness.)
    for dh in range(kh):
        h_idx = (pl.ds(row0 + dh, tho, stride=sh) if sh > 1
                 else pl.ds(row0 + dh, tho))
        for dw in range(kw):
            w_idx = pl.ds(dw, wo, stride=sw) if sw > 1 else pl.ds(dw, wo)
            t = dh * kw + dw
            col_ref[:, :, :, t * cin:(t + 1) * cin] = x_ref[:, h_idx, w_idx, :]

    # Single MXU matmul: (rows, KH*KW*Cin) @ (KH*KW*Cin, CoutP), f32 accumulation.
    acc = jnp.dot(col_ref[...].reshape(rows, k_total), w_ref[...],
                  preferred_element_type=jnp.float32)
    acc = acc + b_ref[...]                       # f32 bias, broadcast over rows
    o_ref[...] = acc.reshape(tn, tho, wo, coutp).astype(o_ref.dtype)


def fconv2d_same(x, weight, bias=None, stride=1, dilation=1, groups=1):
    """JAX/Pallas equivalent of FConv2dSame.forward.

    x      : (N, Cin, H, W)       NCHW, like PyTorch.
    weight : (Cout, Cin, KH, KW)  OIHW, like PyTorch.
    bias   : (Cout,) or None.
    Returns (N, Cout, Ho, Wo) in x.dtype.
    """
    if groups != 1:
        # TODO(synk): grouped convolution (groups > 1) is not implemented in the Pallas kernel.
        raise NotImplementedError("fconv2d_same: only groups=1 is supported")

    n, cin, h, w = x.shape
    cout, cin_w, kh, kw = weight.shape
    assert cin_w == cin, (cin_w, cin)
    s = int(stride)
    d = int(dilation)

    # --- TF-style "same" padding, exactly as the module's forward() computes it. ---
    tgt_h = -(-h // s)                       # ceil(H / stride)
    tgt_w = -(-w // s)
    pad_h = max(0, (tgt_h - 1) * s + (kh - 1) * d + 1 - h)
    pad_w = max(0, (tgt_w - 1) * s + (kw - 1) * d + 1 - w)
    pad_top, pad_left = pad_h // 2, pad_w // 2       # bottom/right take the odd element
    hp, wp = h + pad_h, w + pad_w
    # The module calls F.conv2d WITHOUT dilation -> un-dilated conv on the padded input.
    ho = (hp - kh) // s + 1
    wo = (wp - kw) // s + 1

    # Lane-dense output stores / full-width MXU N dim: pad Cout to a multiple of 128.
    coutp = -(-cout // 128) * 128
    k_total = kh * kw * cin
    isz = jnp.dtype(x.dtype).itemsize

    # --- Generation-aware VMEM budget (v5e/v6e: 128 MiB, v7x: 64 MiB per TC). ---
    try:
        vmem_cap = int(pltpu.get_tpu_info().vmem_capacity_bytes)
    except Exception:
        vmem_cap = 64 * 1024 * 1024           # conservative fallback = v7x size
    budget = max(vmem_cap // 3, 8 * 1024 * 1024)   # per-grid-step working-set target

    def _hp_alloc(tho):
        ho_pad_ = -(-ho // tho) * tho
        return max(hp, (ho_pad_ - 1) * s + kh)

    def _step_bytes(tn, tho):
        hpa = _hp_alloc(tho)
        return (2 * tn * hpa * wp * cin * isz          # double-buffered input block
                + 2 * tn * tho * wo * coutp * isz      # double-buffered output block
                + tn * tho * wo * k_total * isz        # im2col scratch
                + tn * tho * wo * coutp * 4            # transient f32 matmul result
                + 2 * k_total * coutp * isz            # resident weight
                + 2 * coutp * 4)                       # resident f32 bias

    tile_ho = ho
    while tile_ho > 1 and _step_bytes(1, tile_ho) > budget:
        tile_ho = -(-tile_ho // 2)
    tile_n = max(1, min(n, budget // max(_step_bytes(1, tile_ho), 1)))
    while tile_n > 1 and _step_bytes(tile_n, tile_ho) > budget:
        tile_n -= 1
    # Force >= 2 grid steps when the problem allows it: the software pipeline needs
    # something to overlap, and v7x only shards 'parallel' axes across its 2 TensorCores
    # when the grid actually has multiple steps.
    if (-(-n // tile_n)) * (-(-ho // tile_ho)) < 2:
        if n >= 2:
            tile_n = -(-n // 2)
        elif ho >= 2:
            tile_ho = -(-ho // 2)

    ho_pad = -(-ho // tile_ho) * tile_ho
    hp_alloc = max(hp, (ho_pad - 1) * s + kh)    # extra zero rows so Ho tiles never read OOB
    n_pad = (-n) % tile_n
    n_total = n + n_pad
    grid = (n_total // tile_n, ho_pad // tile_ho)

    # --- Layout plumbing: NCHW->NHWC transpose + zero pad in ONE fused XLA pass. ---
    # TODO(synk): if the surrounding model kept activations NHWC end-to-end, these
    # wrapper transposes (a full HBM round-trip each way) would disappear entirely.
    x_nhwc = jnp.transpose(x, (0, 2, 3, 1))                        # (N, H, W, Cin)
    x_padded = jnp.pad(
        x_nhwc,
        ((0, n_pad),
         (pad_top, hp_alloc - h - pad_top),
         (pad_left, wp - w - pad_left),
         (0, 0)))

    # Tap-folded weight: (Cout, Cin, KH, KW) -> (KH, KW, Cin, Cout) -> (KH*KW*Cin, CoutP).
    w_folded = jnp.transpose(weight, (2, 3, 1, 0)).reshape(k_total, cout)
    w_folded = jnp.pad(w_folded, ((0, 0), (0, coutp - cout))).astype(x.dtype)
    # Bias stays float32 (added to the f32 accumulator, matching PyTorch's f32 bias add).
    if bias is None:
        b2 = jnp.zeros((1, coutp), dtype=jnp.float32)
    else:
        b2 = jnp.pad(bias.astype(jnp.float32).reshape(1, cout),
                     ((0, 0), (0, coutp - cout)))

    kernel = functools.partial(_conv2d_same_kernel, kh=kh, kw=kw, sh=s, sw=s)
    vmem_limit = int(min(vmem_cap * 3 // 4, max(2 * budget, 32 * 1024 * 1024)))

    out_padded = pl.pallas_call(
        kernel,
        out_shape=jax.ShapeDtypeStruct((n_total, ho_pad, wo, coutp), x.dtype),
        grid_spec=pltpu.PrefetchScalarGridSpec(
            num_scalar_prefetch=0,
            grid=grid,
            in_specs=[
                # Input block: full padded H/W of one batch tile.  Its block index does
                # not depend on the Ho-tile axis, so it is fetched once per batch tile
                # and stays VMEM-resident while the inner axis sweeps output-row tiles.
                pl.BlockSpec((tile_n, hp_alloc, wp, cin), lambda i, j: (i, 0, 0, 0)),
                # Weight / bias: constant block index -> resident across the whole grid.
                pl.BlockSpec((k_total, coutp), lambda i, j: (0, 0)),
                pl.BlockSpec((1, coutp), lambda i, j: (0, 0)),
            ],
            out_specs=pl.BlockSpec((tile_n, tile_ho, wo, coutp),
                                   lambda i, j: (i, j, 0, 0)),
            scratch_shapes=[pltpu.VMEM((tile_n, tile_ho, wo, k_total), x.dtype)],
        ),
        compiler_params=pltpu.CompilerParams(
            dimension_semantics=("parallel", "parallel"),
            vmem_limit_bytes=vmem_limit),
    )(x_padded, w_folded, b2)

    out = out_padded[:n, :ho, :, :cout]
    return jnp.transpose(out, (0, 3, 1, 2))                         # (N, Cout, Ho, Wo)


def _reference_fconv2d_same(x, weight, bias=None, stride=1, dilation=1, groups=1):
    """Pure-JAX reference with identical semantics (HIGHEST precision), for testing."""
    h, w = x.shape[-2:]
    kh, kw = weight.shape[-2:]
    s, d = int(stride), int(dilation)
    tgt_h = -(-h // s)
    tgt_w = -(-w // s)
    pad_h = max(0, (tgt_h - 1) * s + (kh - 1) * d + 1 - h)
    pad_w = max(0, (tgt_w - 1) * s + (kw - 1) * d + 1 - w)
    xp = jnp.pad(x, ((0, 0), (0, 0),
                     (pad_h // 2, pad_h - pad_h // 2),
                     (pad_w // 2, pad_w - pad_w // 2)))
    out = jax.lax.conv_general_dilated(
        xp, weight, window_strides=(s, s), padding="VALID",
        dimension_numbers=("NCHW", "OIHW", "NCHW"),
        feature_group_count=groups,
        precision=jax.lax.Precision.HIGHEST)
    if bias is not None:
        out = out + bias[None, :, None, None]
    return out.astype(x.dtype)


if __name__ == "__main__":
    key = jax.random.PRNGKey(0)
    k_x, k_w, k_b, k_x2, k_w2 = jax.random.split(key, 5)

    # Case 1: FConv2dSame(weight=(8,4,3,3), bias=(8,), stride=2) on a (2,4,16,16) image.
    x = jax.random.normal(k_x, (2, 4, 16, 16), dtype=jnp.float32)
    weight = jax.random.normal(k_w, (8, 4, 3, 3), dtype=jnp.float32) * 0.1
    bias = jax.random.normal(k_b, (8,), dtype=jnp.float32) * 0.1

    out = jax.block_until_ready(fconv2d_same(x, weight, bias=bias, stride=2))
    ref = _reference_fconv2d_same(x, weight, bias=bias, stride=2)
    assert out.shape == (2, 8, 8, 8), out.shape
    # Tight tolerance: both sides are f32-accurate matmul/conv paths.
    assert jnp.allclose(out, ref, atol=2e-5, rtol=2e-5), float(
        jnp.max(jnp.abs(out - ref)))

    # Case 2: stride=1, no bias, odd spatial size, dilation=2.  Dilation enters ONLY the
    # padding arithmetic (the module calls F.conv2d without dilation); this test pins
    # that quirk so nobody "fixes" it later.
    x2 = jax.random.normal(k_x2, (1, 3, 9, 9), dtype=jnp.float32)
    w2 = jax.random.normal(k_w2, (5, 3, 3, 3), dtype=jnp.float32) * 0.1
    out2 = jax.block_until_ready(fconv2d_same(x2, w2, bias=None, stride=1, dilation=2))
    ref2 = _reference_fconv2d_same(x2, w2, bias=None, stride=1, dilation=2)
    assert out2.shape == ref2.shape, (out2.shape, ref2.shape)
    assert jnp.allclose(out2, ref2, atol=2e-5, rtol=2e-5), float(
        jnp.max(jnp.abs(out2 - ref2)))

    print("KERNEL_OK")
</pallas_src>

<mosaic_0001>
module attributes {stable_mosaic.version = 11 : i64} {
  func.func @_conv2d_same_kernel(%arg0: i32, %arg1: i32, %arg2: memref<1x17x17x4xf32, #tpu.memory_space<vmem>>, %arg3: memref<36x128xf32, #tpu.memory_space<vmem>>, %arg4: memref<1x128xf32, #tpu.memory_space<vmem>>, %arg5: memref<1x8x8x128xf32, #tpu.memory_space<vmem>>, %arg6: memref<1x8x8x36xf32, #tpu.memory_space<vmem>>) attributes {dimension_semantics = [#tpu.dimension_semantics<parallel>, #tpu.dimension_semantics<parallel>], iteration_bounds = array<i64: 2, 1>, scalar_prefetch = 0 : i64, scratch_operands = 1 : i64, tpu.core_type = #tpu.core_type<tc>, window_params = [{transform_indices = @transform_0, window_bounds = array<i64: 1, 17, 17, 4>}, {pipeline_mode = #tpu.pipeline_mode<synchronous>, transform_indices = @transform_1, window_bounds = array<i64: 36, 128>}, {pipeline_mode = #tpu.pipeline_mode<synchronous>, transform_indices = @transform_2, window_bounds = array<i64: 1, 128>}, {transform_indices = @transform_3, window_bounds = array<i64: 1, 8, 8, 128>}]} {
    %c16_i32 = arith.constant 16 : i32
    %0 = arith.muli %arg1, %c16_i32 : i32
    %1 = tpu.assume_multiple %0, 16 : i32
    %c0_i32 = arith.constant 0 : i32
    %2 = arith.addi %1, %c0_i32 : i32
    %c0 = arith.constant 0 : index
    %3 = arith.index_cast %2 : i32 to index
    %c0_0 = arith.constant 0 : index
    %c0_1 = arith.constant 0 : index
    %4 = tpu.strided_load %arg2[%c0, %3, %c0_0, %c0_1] {strides = array<i32: 1, 2, 2, 1>} : memref<1x17x17x4xf32, #tpu.memory_space<vmem>>, vector<1x8x8x4xf32>
    %c0_2 = arith.constant 0 : index
    %c0_3 = arith.constant 0 : index
    %c0_4 = arith.constant 0 : index
    %c0_5 = arith.constant 0 : index
    %5 = vector.load %arg6[%c0_2, %c0_3, %c0_4, %c0_5] : memref<1x8x8x36xf32, #tpu.memory_space<vmem>>, vector<1x8x8x4xf32>
    tpu.vector_store %arg6[%c0_2, %c0_3, %c0_4, %c0_5], %4 {strides = array<i32>} : memref<1x8x8x36xf32, #tpu.memory_space<vmem>>, vector<1x8x8x4xf32>,
    %c0_6 = arith.constant 0 : index
    %6 = arith.index_cast %2 : i32 to index
    %c1 = arith.constant 1 : index
    %c0_7 = arith.constant 0 : index
    %7 = tpu.strided_load %arg2[%c0_6, %6, %c1, %c0_7] {strides = array<i32: 1, 2, 2, 1>} : memref<1x17x17x4xf32, #tpu.memory_space<vmem>>, vector<1x8x8x4xf32>
    %c0_8 = arith.constant 0 : index
    %c0_9 = arith.constant 0 : index
    %c0_10 = arith.constant 0 : index
    %c4 = arith.constant 4 : index
    %8 = vector.load %arg6[%c0_8, %c0_9, %c0_10, %c4] : memref<1x8x8x36xf32, #tpu.memory_space<vmem>>, vector<1x8x8x4xf32>
    tpu.vector_store %arg6[%c0_8, %c0_9, %c0_10, %c4], %7 {strides = array<i32>} : memref<1x8x8x36xf32, #tpu.memory_space<vmem>>, vector<1x8x8x4xf32>,
    %c0_11 = arith.constant 0 : index
    %9 = arith.index_cast %2 : i32 to index
    %c2 = arith.constant 2 : index
    %c0_12 = arith.constant 0 : index
    %10 = tpu.strided_load %arg2[%c0_11, %9, %c2, %c0_12] {strides = array<i32: 1, 2, 2, 1>} : memref<1x17x17x4xf32, #tpu.memory_space<vmem>>, vector<1x8x8x4xf32>
    %c0_13 = arith.constant 0 : index
    %c0_14 = arith.constant 0 : index
    %c0_15 = arith.constant 0 : index
    %c8 = arith.constant 8 : index
    %11 = vector.load %arg6[%c0_13, %c0_14, %c0_15, %c8] : memref<1x8x8x36xf32, #tpu.memory_space<vmem>>, vector<1x8x8x4xf32>
    tpu.vector_store %arg6[%c0_13, %c0_14, %c0_15, %c8], %10 {strides = array<i32>} : memref<1x8x8x36xf32, #tpu.memory_space<vmem>>, vector<1x8x8x4xf32>,
    %c1_i32 = arith.constant 1 : i32
    %12 = arith.addi %1, %c1_i32 : i32
    %c0_16 = arith.constant 0 : index
    %13 = arith.index_cast %12 : i32 to index
    %c0_17 = arith.constant 0 : index
    %c0_18 = arith.constant 0 : index
    %14 = tpu.strided_load %arg2[%c0_16, %13, %c0_17, %c0_18] {strides = array<i32: 1, 2, 2, 1>} : memref<1x17x17x4xf32, #tpu.memory_space<vmem>>, vector<1x8x8x4xf32>
    %c0_19 = arith.constant 0 : index
    %c0_20 = arith.constant 0 : index
    %c0_21 = arith.constant 0 : index
    %c12 = arith.constant 12 : index
    %15 = vector.load %arg6[%c0_19, %c0_20, %c0_21, %c12] : memref<1x8x8x36xf32, #tpu.memory_space<vmem>>, vector<1x8x8x4xf32>
    tpu.vector_store %arg6[%c0_19, %c0_20, %c0_21, %c12], %14 {strides = array<i32>} : memref<1x8x8x36xf32, #tpu.memory_space<vmem>>, vector<1x8x8x4xf32>,
    %c0_22 = arith.constant 0 : index
    %16 = arith.index_cast %12 : i32 to index
    %c1_23 = arith.constant 1 : index
    %c0_24 = arith.constant 0 : index
    %17 = tpu.strided_load %arg2[%c0_22, %16, %c1_23, %c0_24] {strides = array<i32: 1, 2, 2, 1>} : memref<1x17x17x4xf32, #tpu.memory_space<vmem>>, vector<1x8x8x4xf32>
    %c0_25 = arith.constant 0 : index
    %c0_26 = arith.constant 0 : index
    %c0_27 = arith.constant 0 : index
    %c16 = arith.constant 16 : index
    %18 = vector.load %arg6[%c0_25, %c0_26, %c0_27, %c16] : memref<1x8x8x36xf32, #tpu.memory_space<vmem>>, vector<1x8x8x4xf32>
    tpu.vector_store %arg6[%c0_25, %c0_26, %c0_27, %c16], %17 {strides = array<i32>} : memref<1x8x8x36xf32, #tpu.memory_space<vmem>>, vector<1x8x8x4xf32>,
    %c0_28 = arith.constant 0 : index
    %19 = arith.index_cast %12 : i32 to index
    %c2_29 = arith.constant 2 : index
    %c0_30 = arith.constant 0 : index
    %20 = tpu.strided_load %arg2[%c0_28, %19, %c2_29, %c0_30] {strides = array<i32: 1, 2, 2, 1>} : memref<1x17x17x4xf32, #tpu.memory_space<vmem>>, vector<1x8x8x4xf32>
    %c0_31 = arith.constant 0 : index
    %c0_32 = arith.constant 0 : index
    %c0_33 = arith.constant 0 : index
    %c20 = arith.constant 20 : index
    %21 = vector.load %arg6[%c0_31, %c0_32, %c0_33, %c20] : memref<1x8x8x36xf32, #tpu.memory_space<vmem>>, vector<1x8x8x4xf32>
    tpu.vector_store %arg6[%c0_31, %c0_32, %c0_33, %c20], %20 {strides = array<i32>} : memref<1x8x8x36xf32, #tpu.memory_space<vmem>>, vector<1x8x8x4xf32>,
    %c2_i32 = arith.constant 2 : i32
    %22 = arith.addi %1, %c2_i32 : i32
    %c0_34 = arith.constant 0 : index
    %23 = arith.index_cast %22 : i32 to index
    %c0_35 = arith.constant 0 : index
    %c0_36 = arith.constant 0 : index
    %24 = tpu.strided_load %arg2[%c0_34, %23, %c0_35, %c0_36] {strides = array<i32: 1, 2, 2, 1>} : memref<1x17x17x4xf32, #tpu.memory_space<vmem>>, vector<1x8x8x4xf32>
    %c0_37 = arith.constant 0 : index
    %c0_38 = arith.constant 0 : index
    %c0_39 = arith.constant 0 : index
    %c24 = arith.constant 24 : index
    %25 = vector.load %arg6[%c0_37, %c0_38, %c0_39, %c24] : memref<1x8x8x36xf32, #tpu.memory_space<vmem>>, vector<1x8x8x4xf32>
    tpu.vector_store %arg6[%c0_37, %c0_38, %c0_39, %c24], %24 {strides = array<i32>} : memref<1x8x8x36xf32, #tpu.memory_space<vmem>>, vector<1x8x8x4xf32>,
    %c0_40 = arith.constant 0 : index
    %26 = arith.index_cast %22 : i32 to index
    %c1_41 = arith.constant 1 : index
    %c0_42 = arith.constant 0 : index
    %27 = tpu.strided_load %arg2[%c0_40, %26, %c1_41, %c0_42] {strides = array<i32: 1, 2, 2, 1>} : memref<1x17x17x4xf32, #tpu.memory_space<vmem>>, vector<1x8x8x4xf32>
    %c0_43 = arith.constant 0 : index
    %c0_44 = arith.constant 0 : index
    %c0_45 = arith.constant 0 : index
    %c28 = arith.constant 28 : index
    %28 = vector.load %arg6[%c0_43, %c0_44, %c0_45, %c28] : memref<1x8x8x36xf32, #tpu.memory_space<vmem>>, vector<1x8x8x4xf32>
    tpu.vector_store %arg6[%c0_43, %c0_44, %c0_45, %c28], %27 {strides = array<i32>} : memref<1x8x8x36xf32, #tpu.memory_space<vmem>>, vector<1x8x8x4xf32>,
    %c0_46 = arith.constant 0 : index
    %29 = arith.index_cast %22 : i32 to index
    %c2_47 = arith.constant 2 : index
    %c0_48 = arith.constant 0 : index
    %30 = tpu.strided_load %arg2[%c0_46, %29, %c2_47, %c0_48] {strides = array<i32: 1, 2, 2, 1>} : memref<1x17x17x4xf32, #tpu.memory_space<vmem>>, vector<1x8x8x4xf32>
    %c0_49 = arith.constant 0 : index
    %c0_50 = arith.constant 0 : index
    %c0_51 = arith.constant 0 : index
    %c32 = arith.constant 32 : index
    %31 = vector.load %arg6[%c0_49, %c0_50, %c0_51, %c32] : memref<1x8x8x36xf32, #tpu.memory_space<vmem>>, vector<1x8x8x4xf32>
    tpu.vector_store %arg6[%c0_49, %c0_50, %c0_51, %c32], %30 {strides = array<i32>} : memref<1x8x8x36xf32, #tpu.memory_space<vmem>>, vector<1x8x8x4xf32>,
    %c0_52 = arith.constant 0 : index
    %c0_53 = arith.constant 0 : index
    %c0_54 = arith.constant 0 : index
    %c0_55 = arith.constant 0 : index
    %32 = vector.load %arg6[%c0_52, %c0_53, %c0_54, %c0_55] : memref<1x8x8x36xf32, #tpu.memory_space<vmem>>, vector<1x8x8x36xf32>
    %33 = vector.shape_cast %32 : vector<1x8x8x36xf32> to vector<64x36xf32>
    %c0_56 = arith.constant 0 : index
    %c0_57 = arith.constant 0 : index
    %34 = vector.load %arg3[%c0_56, %c0_57] : memref<36x128xf32, #tpu.memory_space<vmem>>, vector<36x128xf32>
    %cst = arith.constant dense<0.000000e+00> : vector<64x128xf32>
    %35 = tpu.matmul %33, %34, %cst {dimension_numbers = #tpu.dot_dimension_numbers<[1], [0], [0], [1], [0, 0, 1, 1], [], []>} : vector<64x36xf32>, vector<36x128xf32>, vector<64x128xf32> -> vector<64x128xf32>
    %c0_58 = arith.constant 0 : index
    %c0_59 = arith.constant 0 : index
    %36 = vector.load %arg4[%c0_58, %c0_59] : memref<1x128xf32, #tpu.memory_space<vmem>>, vector<1x128xf32>
    %37 = vector.broadcast %36 : vector<1x128xf32> to vector<64x128xf32>
    %38 = arith.addf %35, %37 : vector<64x128xf32>
    %39 = vector.shape_cast %38 : vector<64x128xf32> to vector<1x8x8x128xf32>
    %c0_60 = arith.constant 0 : index
    %c0_61 = arith.constant 0 : index
    %c0_62 = arith.constant 0 : index
    %c0_63 = arith.constant 0 : index
    %40 = vector.load %arg5[%c0_60, %c0_61, %c0_62, %c0_63] : memref<1x8x8x128xf32, #tpu.memory_space<vmem>>, vector<1x8x8x128xf32>
    tpu.vector_store %arg5[%c0_60, %c0_61, %c0_62, %c0_63], %39 {strides = array<i32>} : memref<1x8x8x128xf32, #tpu.memory_space<vmem>>, vector<1x8x8x128xf32>,
    return
  }
  func.func @transform_0(%arg0: i32, %arg1: i32) -> (i32, i32, i32, i32) {
    %c0_i32 = arith.constant 0 : i32
    %c0_i32_0 = arith.constant 0 : i32
    %c0_i32_1 = arith.constant 0 : i32
    %c0_i32_2 = arith.constant 0 : i32
    return %arg0, %c0_i32, %c0_i32_0, %c0_i32_1 : i32, i32, i32, i32
  }
  func.func @transform_1(%arg0: i32, %arg1: i32) -> (i32, i32) {
    %c0_i32 = arith.constant 0 : i32
    %c0_i32_0 = arith.constant 0 : i32
    %c0_i32_1 = arith.constant 0 : i32
    return %c0_i32, %c0_i32_0 : i32, i32
  }
  func.func @transform_2(%arg0: i32, %arg1: i32) -> (i32, i32) {
    %c0_i32 = arith.constant 0 : i32
    %c0_i32_0 = arith.constant 0 : i32
    %c0_i32_1 = arith.constant 0 : i32
    return %c0_i32, %c0_i32_0 : i32, i32
  }
  func.func @transform_3(%arg0: i32, %arg1: i32) -> (i32, i32, i32, i32) {
    %c0_i32 = arith.constant 0 : i32
    %c0_i32_0 = arith.constant 0 : i32
    %c0_i32_1 = arith.constant 0 : i32
    return %arg0, %arg1, %c0_i32, %c0_i32_0 : i32, i32, i32, i32
  }
}

</mosaic_0001>

<bundles_post_ra>
// kernel: tpu_custom_call.1
= control target key start
LH: loop header
LB: loop body
LE: loop exit
PB: predicated region body
PF: predicated region fallthrough
CT: control target
= control target key end

     0   :  { %8 = vsyncpa [#allocation4], 0  ;;  %s1652_s0 = inlined_call_operand.vmem [shape: f32[2,17,17,4], index: 0, kind: input, shape index: {}]   ;;  %s1653_s1 = inlined_call_operand.vmem [shape: f32[36,128], index: 1, kind: input, shape index: {}]   ;;  %s1654_s2 = inlined_call_operand.vmem [shape: f32[1,128], index: 2, kind: input, shape index: {}]   ;;  %s1655_s3 = inlined_call_operand.hbm [shape: f32[2,8,8,128], index: 3, kind: output, shape index: {}]  }
   0x1   :  { %10 = vsyncpa [#allocation4 + $0x1], 0  ;;  %s1296_s12 = smov 0   ;;  %s1298_s13 = smov 0  }
   0x2   :  { %s1300_s14 = smov 0   ;;  %s1302_s15 = smov 0  }
   0x3   :  { %s1304_s16 = smov 0   ;;  %s1306_s17 = smov 0  }
   0x4 LB: > { %s978_s18 = sadd.s32 4294967295, %s1264_s17   ;;  %s979_s19 = sadd.s32 4294967294, %s1264_s17   ;;  %s1264_s17 = sphi %s1306_s17, %s16_s17   ;;  %s1260_s16 = sphi %s1304_s16, %s1662_s16   ;;  %s1256_s15 = sphi %s1302_s15, %s1661_s15   ;;  %s1252_s14 = sphi %s1300_s14, %s1660_s14   ;;  %s1248_s13 = sphi %s1298_s13, %s1659_s13   ;;  %s1244_s12 = sphi %s1296_s12, %s1658_s12  }
   0x5   : > { %s28_s20 = sadd.s32 1, %s1260_s16  ;;  %s105_s21 = sadd.s32 1, %s1252_s14 }
   0x6   : > { %p30_p0 = scmp.ge.s32.totalorder %s28_s20, 2  ;;  %p115_p1 = scmp.ne.s32.totalorder %s1252_s14, %s1248_s13 }
   0x7   : > { %p116_p2 = scmp.eq.s32.totalorder %s978_s18, 1  ;;  %p121_p3 = scmp.ne.s32.totalorder %s1248_s13, %s1244_s12 }
   0x8   : > { %s1664_s20 = smov (%p30_p0, %s28_s20), 0  ;;  %p122_p5 = scmp.eq.s32.totalorder %s979_s19, 1 }
   0x9   : > { %p1336_p4 = por %p116_p2, %p115_p1  ;;  %s100_s23 = ssub.s32 %s1260_s16, %s1664_s20 }
   0xa   : > { %p982_p6 = scmp.ge.s32.totalorder %s1264_s17, 1  ;;  %p103_p7 = scmp.eq.s32.totalorder %s100_s23, 0 }
   0xb   : > { %p1343_p8 = por %p122_p5, %p121_p3  ;;  %p154_p9 = scmp.lt.s32.totalorder %s1264_s17, 3 }
   0xc   : > { %s1349_s25 = scalar_select %p103_p7, %s1252_s14, %s105_s21  }
   0xd   : > { %p155_p10 = pnand %p982_p6, %p154_p9 }
   0xe   : > { %p178_p11 = scmp.lt.s32.totalorder (!%p155_p10), %s1256_s15, 1  ;;  %s1266_s4 = smov (!%p155_p10), 4   ;;  %vm202_vm0 = vcmask (!%p155_p10), 31744   ;;  %v679_v50 = vld [vmem:[%s1653_s1] sm:$0xff] (!%p155_p10)  ;;  %v680_v51 = vld [vmem:[%s1653_s1 + $0x8] sm:$0xff] (!%p155_p10)  ;;  %v681_v55 = vld [vmem:[%s1653_s1 + $0x10] sm:$0xff] (!%p155_p10) }
   0xf   : > { %158 = sbr.rel (%p155_p10) target bundleno = 506 (0x1fa), region = 32  ;;  %s1267_s5 = smov (!%p155_p10), 8   ;;  %v1107_v52 = vpack.c.bf16 (!%p155_p10), %v680_v51, %v679_v50  ;;  %v682_v56 = vld [vmem:[%s1653_s1 + $0x18] sm:$0xff] (!%p155_p10)  ;;  %v683_v60 = vld [vmem:[%s1653_s1 + $0x20] sm:$0xf] (!%p155_p10)  ;;  %vm716_vm1 = vcmask (!%p155_p10), 1043456  }
  0x10   : > { %s1268_s6 = smov (!%p155_p10), 12   ;;  %s1269_s7 = smov (!%p155_p10), 16   ;;  %v1111_v57 = vpack.c.bf16 (!%p155_p10), %v682_v56, %v681_v55  ;;  %vm259_vm2 = vcmask (!%p155_p10), 64544   ;;  %vm316_vm3 = vcmask (!%p155_p10), 97344   ;;  %vm375_vm4 = vcmask (!%p155_p10), 130144  }
  0x11   : > { %s1270_s8 = smov (!%p155_p10), 20   ;;  %s1271_s9 = smov (!%p155_p10), 24   ;;  %1108 = vmatprep.subr.bf16.mxu0 (!%p155_p10), %v1107_v52  ;;  %1115 = vmatprep.subr.bf16.mxu1 (!%p155_p10), %v1107_v52  ;;  %vm432_vm5 = vcmask (!%p155_p10), 162944   ;;  %vm489_vm6 = vcmask (!%p155_p10), 195744   ;;  %vm548_vm7 = vcmask (!%p155_p10), 228544   ;;  %vm605_vm8 = vcmask (!%p155_p10), 261344  }
  0x12   : > { %s1272_s10 = smov (!%p155_p10), 28   ;;  %1110 = vmatpush3.bf16.msra.mxu0 (!%p155_p10), %v1107_v52  ;;  %1118 = vmatpush3.bf16.msra.mxu1 (!%p155_p10), %v1107_v52  ;;  %s1273_s29 = smov (!%p155_p10), 32   ;;  %vm662_vm9 = vcmask (!%p155_p10), 294144   ;;  %vm691_vm10 = vcmask (!%p155_p10), 293888  }
  0x13   : > { %1112 = vmatprep.subr.bf16.mxu0 (!%p155_p10), %v1111_v57  ;;  %1116 = vmatprep.subr.bf16.mxu1 (!%p155_p10), %v1111_v57  ;;  %s1071_s11 = sshll.u32 (!%p155_p10), %s1256_s15, 10 }
  0x14   : > { %s1599_s23 = scalar_lea.hbm (!%p155_p10), %s1655_s3, %s1071_s11 }
  0x16   : > { %s179_s26 = scalar_select %p178_p11, %s1256_s15, 1  ;;  %1114 = vmatpush3.bf16.msra.mxu0 %v1111_v57  ;;  %1119 = vmatpush3.bf16.msra.mxu1 %v1111_v57 }
  0x17   : > { %1093 = vmatprep.subr.msk.mxu0 %vm716_vm1, %v683_v60  ;;  %1117 = vmatprep.subr.msk.mxu1 %vm716_vm1, %v683_v60 }
  0x18   : > { %s1121_s27 = smul.u32 408, %s179_s26 }
  0x1a   : > { %s1356_s30 = scalar_lea.vmem %s1652_s0, %s1121_s27  ;;  %1094 = vmatpush3.msk.msra.mxu0 %vm716_vm1, %v683_v60  ;;  %1120 = vmatpush3.msk.msra.mxu1 %vm716_vm1, %v683_v60  ;;  %s1274_s27 = smov [#allocation3]  }
  0x1b   : > { %v993_v0 = vld [vmem:[%s1356_s30 + $0x31] ss:$2 sm:$0xff]  ;;  %v992_v1 = vld [vmem:[%s1356_s30 + $0x1] ss:$2 sm:$0xff]  ;;  %v1004_v4 = vld [vmem:[%s1356_s30 + $0xc2] ss:$2 sm:$0xff] }
  0x1c   : > { %237 = vrot.lane.b32.xlu1 %v993_v0, %s1266_s4  ;;  %235 = vrot.lane.b32.xlu0 %v992_v1, %s1266_s4  ;;  %v997_v2 = vld [vmem:[%s1356_s30 + $0xf1] ss:$2 sm:$0xff]  ;;  %v996_v3 = vld [vmem:[%s1356_s30 + $0xc1] ss:$2 sm:$0xff]  ;;  %s1190_s28 = sshll.u32 %s1274_s27, 4  ;;  %s1191_s28 = int_to_ptr.vmem [resolvable:$false] %s1190_s28 }
  0x1d   : > { %v1000_v5 = vld [vmem:[%s1356_s30 + $0x2] ss:$2 sm:$0xff]  ;;  %v1005_v6 = vld [vmem:[%s1356_s30 + $0xf2] ss:$2 sm:$0xff]  ;;  %v1020_v14 = vld [vmem:[%s1356_s30 + $0xd9] ss:$2 sm:$0xff] }
  0x1e   : > { %v1001_v7 = vld [vmem:[%s1356_s30 + $0x32] ss:$2 sm:$0xff]  ;;  %v1016_v15 = vld [vmem:[%s1356_s30 + $0x19] ss:$2 sm:$0xff]  ;;  %v1021_v24 = vld [vmem:[%s1356_s30 + $0x109] ss:$2 sm:$0xff] }
  0x1f   : > { %v1012_v8 = vld [vmem:[%s1356_s30 + $0xd8] ss:$2 sm:$0xff]  ;;  %v1013_v10 = vld [vmem:[%s1356_s30 + $0x108] ss:$2 sm:$0xff]  ;;  %v998_v19 = vld [vmem:[%s1356_s30 + $0x121] ss:$2 sm:$0xff] }
  0x20   : > { %245 = vrot.lane.b32.xlu1 %v997_v2, %s1266_s4  ;;  %243 = vrot.lane.b32.xlu0 %v996_v3, %s1266_s4  ;;  %v1008_v9 = vld [vmem:[%s1356_s30 + $0x18] ss:$2 sm:$0xff]  ;;  %v1009_v11 = vld [vmem:[%s1356_s30 + $0x48] ss:$2 sm:$0xff] }
  0x21   : > { %v985_v12 = vld [vmem:[%s1356_s30 + $0x30] ss:$2 sm:$0xff]  ;;  %v187_v13 = vld [vmem:[%s1356_s30] ss:$2 sm:$0xff]  ;;  %v994_v21 = vld [vmem:[%s1356_s30 + $0x61] ss:$2 sm:$0xff] }
  0x22   : > { %204 = vst.msk [vmem:[#allocation2 + $0x8] sm:$0xff] %vm202_vm0, %v985_v12  ;;  %203 = vst.msk [vmem:[#allocation2] sm:$0xff] %vm202_vm0, %v187_v13  ;;  %v989_v16 = vld [vmem:[%s1356_s30 + $0xf0] ss:$2 sm:$0xff]  ;;  %v988_v17 = vld [vmem:[%s1356_s30 + $0xc0] ss:$2 sm:$0xff] }
  0x23   : > { %208 = vst.msk [vmem:[#allocation2 + $0x28] sm:$0xff] %vm202_vm0, %v989_v16  ;;  %207 = vst.msk [vmem:[#allocation2 + $0x20] sm:$0xff] %vm202_vm0, %v988_v17  ;;  %v990_v18 = vld [vmem:[%s1356_s30 + $0x120] ss:$2 sm:$0xff]  ;;  %v991_v22 = vld [vmem:[%s1356_s30 + $0x150] ss:$2 sm:$0xff] }
  0x24   : > { %300 = vrot.lane.b32.xlu1 %v1004_v4, %s1267_s5  ;;  %292 = vrot.lane.b32.xlu0 %v1000_v5, %s1267_s5  ;;  %209 = vst.msk [vmem:[#allocation2 + $0x30] sm:$0xff] %vm202_vm0, %v990_v18  ;;  %v986_v20 = vld [vmem:[%s1356_s30 + $0x60] ss:$2 sm:$0xff]  ;;  %v987_v23 = vld [vmem:[%s1356_s30 + $0x90] ss:$2 sm:$0xff]  ;;  %210 = vst.msk [vmem:[#allocation2 + $0x38] sm:$0xff] %vm202_vm0, %v991_v22 }
  0x25   : > { %205 = vst.msk [vmem:[#allocation2 + $0x10] sm:$0xff] %vm202_vm0, %v986_v20  ;;  %206 = vst.msk [vmem:[#allocation2 + $0x18] sm:$0xff] %vm202_vm0, %v987_v23  ;;  %v1017_v25 = vld [vmem:[%s1356_s30 + $0x49] ss:$2 sm:$0xff]  ;;  %v1028_v26 = vld [vmem:[%s1356_s30 + $0xda] ss:$2 sm:$0xff] }
  0x26   : > { %v1024_v27 = vld [vmem:[%s1356_s30 + $0x1a] ss:$2 sm:$0xff]  ;;  %v999_v28 = vld [vmem:[%s1356_s30 + $0x151] ss:$2 sm:$0xff]  ;;  %v1029_v32 = vld [vmem:[%s1356_s30 + $0x10a] ss:$2 sm:$0xff] }
  0x27   : > { %v995_v29 = vld [vmem:[%s1356_s30 + $0x91] ss:$2 sm:$0xff]  ;;  %v1006_v30 = vld [vmem:[%s1356_s30 + $0x122] ss:$2 sm:$0xff]  ;;  %v1007_v36 = vld [vmem:[%s1356_s30 + $0x152] ss:$2 sm:$0xff] }
  0x28   : > { %302 = vrot.lane.b32.xlu1 %v1005_v6, %s1267_s5  ;;  %294 = vrot.lane.b32.xlu0 %v1001_v7, %s1267_s5  ;;  %v1002_v31 = vld [vmem:[%s1356_s30 + $0x62] ss:$2 sm:$0xff]  ;;  %v1003_v37 = vld [vmem:[%s1356_s30 + $0x92] ss:$2 sm:$0xff] }
  0x29   : > { %v1025_v33 = vld [vmem:[%s1356_s30 + $0x4a] ss:$2 sm:$0xff]  ;;  %v1044_v42 = vld [vmem:[%s1356_s30 + $0xf1] ss:$2 sm:$0xff]  ;;  %v1045_v48 = vld [vmem:[%s1356_s30 + $0x121] ss:$2 sm:$0xff] }
  0x2a   : > { %v1036_v34 = vld [vmem:[%s1356_s30 + $0xf0] ss:$2 sm:$0xff]  ;;  %v1037_v40 = vld [vmem:[%s1356_s30 + $0x120] ss:$2 sm:$0xff]  ;;  %v1040_v43 = vld [vmem:[%s1356_s30 + $0x31] ss:$2 sm:$0xff] }
  0x2b   : > { %v1032_v35 = vld [vmem:[%s1356_s30 + $0x30] ss:$2 sm:$0xff]  ;;  %v1033_v41 = vld [vmem:[%s1356_s30 + $0x60] ss:$2 sm:$0xff]  ;;  %v1022_v46 = vld [vmem:[%s1356_s30 + $0x139] ss:$2 sm:$0xff] }
  0x2c   : > { %359 = vrot.lane.b32.xlu1 %v1012_v8, %s1268_s6  ;;  %351 = vrot.lane.b32.xlu0 %v1008_v9, %s1268_s6  ;;  %v1014_v38 = vld [vmem:[%s1356_s30 + $0x138] ss:$2 sm:$0xff]  ;;  %v1015_v44 = vld [vmem:[%s1356_s30 + $0x168] ss:$2 sm:$0xff] }
  0x2d   : > { %v1010_v39 = vld [vmem:[%s1356_s30 + $0x78] ss:$2 sm:$0xff]  ;;  %v1011_v45 = vld [vmem:[%s1356_s30 + $0xa8] ss:$2 sm:$0xff]  ;;  %v1018_v47 = vld [vmem:[%s1356_s30 + $0x79] ss:$2 sm:$0xff] }
  0x2e   : > { %v1041_v49 = vld [vmem:[%s1356_s30 + $0x61] ss:$2 sm:$0xff]  ;;  %v1052_v53 = vld [vmem:[%s1356_s30 + $0xf2] ss:$2 sm:$0xff]  ;;  %v1053_v63 = vld [vmem:[%s1356_s30 + $0x122] ss:$2 sm:$0xff] }
  0x2f   : > { %v1048_v54 = vld [vmem:[%s1356_s30 + $0x32] ss:$2 sm:$0xff]  ;;  %v1023_v58 = vld [vmem:[%s1356_s30 + $0x169] ss:$2 sm:$0xff]  ;;  %v1049_v0 = vld [vmem:[%s1356_s30 + $0x62] ss:$2 sm:$0xff] }
  0x30   : > { %361 = vrot.lane.b32.xlu1 %v1013_v10, %s1268_s6  ;;  %353 = vrot.lane.b32.xlu0 %v1009_v11, %s1268_s6  ;;  %v1019_v59 = vld [vmem:[%s1356_s30 + $0xa9] ss:$2 sm:$0xff]  ;;  %v1030_v61 = vld [vmem:[%s1356_s30 + $0x13a] ss:$2 sm:$0xff] }
  0x31   : > { %v1026_v62 = vld [vmem:[%s1356_s30 + $0x7a] ss:$2 sm:$0xff]  ;;  %v1031_v1 = vld [vmem:[%s1356_s30 + $0x16a] ss:$2 sm:$0xff]  ;;  %v1046_v7 = vld [vmem:[%s1356_s30 + $0x151] ss:$2 sm:$0xff] }
  0x32   : > { %v1027_v2 = vld [vmem:[%s1356_s30 + $0xaa] ss:$2 sm:$0xff]  ;;  %v1042_v8 = vld [vmem:[%s1356_s30 + $0x91] ss:$2 sm:$0xff]  ;;  %v1047_v9 = vld [vmem:[%s1356_s30 + $0x181] ss:$2 sm:$0xff] }
  0x33   : > { %v1038_v3 = vld [vmem:[%s1356_s30 + $0x150] ss:$2 sm:$0xff]  ;;  %v1039_v5 = vld [vmem:[%s1356_s30 + $0x180] ss:$2 sm:$0xff]  ;;  %v1043_v10 = vld [vmem:[%s1356_s30 + $0xc1] ss:$2 sm:$0xff] }
  0x34   : > { %416 = vrot.lane.b32.xlu1 %v1020_v14, %s1269_s7  ;;  %408 = vrot.lane.b32.xlu0 %v1016_v15, %s1269_s7  ;;  %v1034_v4 = vld [vmem:[%s1356_s30 + $0x90] ss:$2 sm:$0xff]  ;;  %v1035_v6 = vld [vmem:[%s1356_s30 + $0xc0] ss:$2 sm:$0xff] }
  0x35   : > { %v1054_v13 = vld [vmem:[%s1356_s30 + $0x152] ss:$2 sm:$0xff]  ;;  %v1055_v17 = vld [vmem:[%s1356_s30 + $0x182] ss:$2 sm:$0xff] }
  0x36   : > { %v1050_v14 = vld [vmem:[%s1356_s30 + $0x92] ss:$2 sm:$0xff]  ;;  %v1051_v18 = vld [vmem:[%s1356_s30 + $0xc2] ss:$2 sm:$0xff]  ;;  %s175_s30 = sand.u32 1, %s1248_s13  }
  0x37   : > { %s1605_s15 = scalar_lea.sflag [#allocation4], %s175_s30 }
  0x38   : > { %247 = vrot.lane.b32.xlu1 %v998_v19, %s1266_s4  ;;  %239 = vrot.lane.b32.xlu0 %v994_v21, %s1266_s4 }
  0x3c   : > { %418 = vrot.lane.b32.xlu1 %v1021_v24, %s1269_s7  ;;  %410 = vrot.lane.b32.xlu0 %v1017_v25, %s1269_s7 }
  0x40   : > { %473 = vrot.lane.b32.xlu1 %v1028_v26, %s1270_s8  ;;  %465 = vrot.lane.b32.xlu0 %v1024_v27, %s1270_s8 }
  0x44   : > { %249 = vrot.lane.b32.xlu1 %v999_v28, %s1266_s4  ;;  %241 = vrot.lane.b32.xlu0 %v995_v29, %s1266_s4 }
  0x48   : > { %304 = vrot.lane.b32.xlu1 %v1006_v30, %s1267_s5  ;;  %296 = vrot.lane.b32.xlu0 %v1002_v31, %s1267_s5 }
  0x4c   : > { %475 = vrot.lane.b32.xlu1 %v1029_v32, %s1270_s8  ;;  %467 = vrot.lane.b32.xlu0 %v1025_v33, %s1270_s8 }
  0x50   : > { %532 = vrot.lane.b32.xlu1 %v1036_v34, %s1271_s9  ;;  %524 = vrot.lane.b32.xlu0 %v1032_v35, %s1271_s9 }
  0x54   : > { %306 = vrot.lane.b32.xlu1 %v1007_v36, %s1267_s5  ;;  %298 = vrot.lane.b32.xlu0 %v1003_v37, %s1267_s5 }
  0x58   : > { %363 = vrot.lane.b32.xlu1 %v1014_v38, %s1268_s6  ;;  %355 = vrot.lane.b32.xlu0 %v1010_v39, %s1268_s6 }
  0x5c   : > { %534 = vrot.lane.b32.xlu1 %v1037_v40, %s1271_s9  ;;  %526 = vrot.lane.b32.xlu0 %v1033_v41, %s1271_s9 }
  0x60   : > { %589 = vrot.lane.b32.xlu1 %v1044_v42, %s1272_s10  ;;  %581 = vrot.lane.b32.xlu0 %v1040_v43, %s1272_s10 }
  0x64   : > { %365 = vrot.lane.b32.xlu1 %v1015_v44, %s1268_s6  ;;  %357 = vrot.lane.b32.xlu0 %v1011_v45, %s1268_s6 }
  0x68   : > { %420 = vrot.lane.b32.xlu1 %v1022_v46, %s1269_s7  ;;  %412 = vrot.lane.b32.xlu0 %v1018_v47, %s1269_s7 }
  0x6c   : > { %591 = vrot.lane.b32.xlu1 %v1045_v48, %s1272_s10  ;;  %583 = vrot.lane.b32.xlu0 %v1041_v49, %s1272_s10 }
  0x70   : > { %646 = vrot.lane.b32.xlu1 %v1052_v53, %s1273_s29  ;;  %638 = vrot.lane.b32.xlu0 %v1048_v54, %s1273_s29 }
  0x74   : > { %422 = vrot.lane.b32.xlu1 %v1023_v58, %s1269_s7  ;;  %414 = vrot.lane.b32.xlu0 %v1019_v59, %s1269_s7  ;;  %s983_s7 = sshll.u32 %s175_s30, 6 }
  0x78   : > { %477 = vrot.lane.b32.xlu1 %v1030_v61, %s1270_s8  ;;  %469 = vrot.lane.b32.xlu0 %v1026_v62, %s1270_s8 }
  0x7c   : > { %648 = vrot.lane.b32.xlu1 %v1053_v63, %s1273_s29  ;;  %640 = vrot.lane.b32.xlu0 %v1049_v0, %s1273_s29 }
  0x80   : > { %479 = vrot.lane.b32.xlu1 %v1031_v1, %s1270_s8  ;;  %471 = vrot.lane.b32.xlu0 %v1027_v2, %s1270_s8 }
  0x84   : > { %536 = vrot.lane.b32.xlu1 %v1038_v3, %s1271_s9  ;;  %528 = vrot.lane.b32.xlu0 %v1034_v4, %s1271_s9 }
  0x88   : > { %538 = vrot.lane.b32.xlu1 %v1039_v5, %s1271_s9  ;;  %530 = vrot.lane.b32.xlu0 %v1035_v6, %s1271_s9 }
  0x8c   : > { %593 = vrot.lane.b32.xlu1 %v1046_v7, %s1272_s10  ;;  %585 = vrot.lane.b32.xlu0 %v1042_v8, %s1272_s10 }
  0x8e   : > { %v238_v11 = vpop.permute.xlu1 %237  ;;  %v236_v12 = vpop.permute.xlu0 %235 }
  0x8f   : > { %261 = vst.msk [vmem:[#allocation2 + $0x8] sm:$0xff] %vm259_vm2, %v238_v11  ;;  %260 = vst.msk [vmem:[#allocation2] sm:$0xff] %vm259_vm2, %v236_v12 }
  0x90   : > { %595 = vrot.lane.b32.xlu1 %v1047_v9, %s1272_s10  ;;  %587 = vrot.lane.b32.xlu0 %v1043_v10, %s1272_s10  ;;  %s177_s10 = scalar_lea.vmem [#allocation3], %s983_s7 }
  0x91   : > { %s849_s18 = sshll.u32 %s177_s10, 4  ;;  %s1601_s18 = int_to_ptr.vmem [resolvable:$true] %s849_s18 }
  0x92   : > { %v246_v15 = vpop.permute.xlu1 %245  ;;  %v244_v16 = vpop.permute.xlu0 %243  ;;  %s1186_s26 = scalar_lea.vmem %s1601_s18, 1024  ;;  %p1193_p1 = scmp.lt.s32.totalorder %s1601_s18, %s1191_s28 }
  0x93   : > { %265 = vst.msk [vmem:[#allocation2 + $0x28] sm:$0xff] %vm259_vm2, %v246_v15  ;;  %264 = vst.msk [vmem:[#allocation2 + $0x20] sm:$0xff] %vm259_vm2, %v244_v16  ;;  %p1187_p12 = scmp.ne.s32.totalorder %s1601_s18, %s1186_s26 }
  0x94   : > { %650 = vrot.lane.b32.xlu1 %v1054_v13, %s1273_s29  ;;  %642 = vrot.lane.b32.xlu0 %v1050_v14, %s1273_s29 }
  0x95   : > { %p1188_p13 = pnand %p1187_p12, %p1336_p4 }
  0x96   : > { %v301_v19 = vpop.permute.xlu1 %300  ;;  %v293_v20 = vpop.permute.xlu0 %292 }
  0x97   : > { %321 = vst.msk [vmem:[#allocation2 + $0x20] sm:$0xff] %vm316_vm3, %v301_v19  ;;  %317 = vst.msk [vmem:[#allocation2] sm:$0xff] %vm316_vm3, %v293_v20  ;;  %p1189_p0 = pneg %p1188_p13 }
  0x98   : > { %652 = vrot.lane.b32.xlu1 %v1055_v17, %s1273_s29  ;;  %644 = vrot.lane.b32.xlu0 %v1051_v18, %s1273_s29  ;;  %s1192_s29 = scalar_lea.vmem %s1191_s28, 2048 }
  0x99   : > { %p1194_p2 = scmp.lt.s32.totalorder %s1192_s29, %s1186_s26 }
  0x9a   : > { %v303_v21 = vpop.permute.xlu1 %302  ;;  %v295_v22 = vpop.permute.xlu0 %294 }
  0x9b   : > { %322 = vst.msk [vmem:[#allocation2 + $0x28] sm:$0xff] %vm316_vm3, %v303_v21  ;;  %318 = vst.msk [vmem:[#allocation2 + $0x8] sm:$0xff] %vm316_vm3, %v295_v22  ;;  %p1195_p3 = por %p1194_p2, %p1193_p1 }
  0x9d   : > { %p1196_p5 = pnand %p1195_p3, %p1189_p0 }
  0x9e   : > { %v360_v23 = vpop.permute.xlu1 %359  ;;  %v352_v24 = vpop.permute.xlu0 %351 }
  0x9f   : > { %380 = vst.msk [vmem:[#allocation2 + $0x20] sm:$0xff] %vm375_vm4, %v360_v23  ;;  %376 = vst.msk [vmem:[#allocation2] sm:$0xff] %vm375_vm4, %v352_v24  ;;  %v1056_v23 = vld [vmem:[%s1654_s2] ss:$0 sm:$0xff] }
  0xa2   : > { %v362_v25 = vpop.permute.xlu1 %361  ;;  %v354_v26 = vpop.permute.xlu0 %353 }
  0xa3   : > { %381 = vst.msk [vmem:[#allocation2 + $0x28] sm:$0xff] %vm375_vm4, %v362_v25  ;;  %377 = vst.msk [vmem:[#allocation2 + $0x8] sm:$0xff] %vm375_vm4, %v354_v26 }
  0xa6   : > { %v417_v27 = vpop.permute.xlu1 %416  ;;  %v409_v28 = vpop.permute.xlu0 %408 }
  0xa7   : > { %437 = vst.msk [vmem:[#allocation2 + $0x20] sm:$0xff] %vm432_vm5, %v417_v27  ;;  %433 = vst.msk [vmem:[#allocation2] sm:$0xff] %vm432_vm5, %v409_v28 }
  0xaa   : > { %v248_v29 = vpop.permute.xlu1 %247  ;;  %v240_v30 = vpop.permute.xlu0 %239 }
  0xab   : > { %266 = vst.msk [vmem:[#allocation2 + $0x30] sm:$0xff] %vm259_vm2, %v248_v29  ;;  %262 = vst.msk [vmem:[#allocation2 + $0x10] sm:$0xff] %vm259_vm2, %v240_v30 }
  0xae   : > { %v419_v31 = vpop.permute.xlu1 %418  ;;  %v411_v32 = vpop.permute.xlu0 %410 }
  0xaf   : > { %438 = vst.msk [vmem:[#allocation2 + $0x28] sm:$0xff] %vm432_vm5, %v419_v31  ;;  %434 = vst.msk [vmem:[#allocation2 + $0x8] sm:$0xff] %vm432_vm5, %v411_v32 }
  0xb2   : > { %v474_v33 = vpop.permute.xlu1 %473  ;;  %v466_v34 = vpop.permute.xlu0 %465 }
  0xb3   : > { %494 = vst.msk [vmem:[#allocation2 + $0x20] sm:$0xff] %vm489_vm6, %v474_v33  ;;  %490 = vst.msk [vmem:[#allocation2] sm:$0xff] %vm489_vm6, %v466_v34 }
  0xb6   : > { %v250_v35 = vpop.permute.xlu1 %249  ;;  %v242_v36 = vpop.permute.xlu0 %241 }
  0xb7   : > { %267 = vst.msk [vmem:[#allocation2 + $0x38] sm:$0xff] %vm259_vm2, %v250_v35  ;;  %263 = vst.msk [vmem:[#allocation2 + $0x18] sm:$0xff] %vm259_vm2, %v242_v36 }
  0xba   : > { %v305_v37 = vpop.permute.xlu1 %304  ;;  %v297_v38 = vpop.permute.xlu0 %296 }
  0xbb   : > { %323 = vst.msk [vmem:[#allocation2 + $0x30] sm:$0xff] %vm316_vm3, %v305_v37  ;;  %319 = vst.msk [vmem:[#allocation2 + $0x10] sm:$0xff] %vm316_vm3, %v297_v38 }
  0xbe   : > { %v476_v39 = vpop.permute.xlu1 %475  ;;  %v468_v40 = vpop.permute.xlu0 %467 }
  0xbf   : > { %495 = vst.msk [vmem:[#allocation2 + $0x28] sm:$0xff] %vm489_vm6, %v476_v39  ;;  %491 = vst.msk [vmem:[#allocation2 + $0x8] sm:$0xff] %vm489_vm6, %v468_v40 }
  0xc2   : > { %v533_v41 = vpop.permute.xlu1 %532  ;;  %v525_v42 = vpop.permute.xlu0 %524 }
  0xc3   : > { %553 = vst.msk [vmem:[#allocation2 + $0x20] sm:$0xff] %vm548_vm7, %v533_v41  ;;  %549 = vst.msk [vmem:[#allocation2] sm:$0xff] %vm548_vm7, %v525_v42 }
  0xc6   : > { %v307_v43 = vpop.permute.xlu1 %306  ;;  %v299_v44 = vpop.permute.xlu0 %298 }
  0xc7   : > { %324 = vst.msk [vmem:[#allocation2 + $0x38] sm:$0xff] %vm316_vm3, %v307_v43  ;;  %320 = vst.msk [vmem:[#allocation2 + $0x18] sm:$0xff] %vm316_vm3, %v299_v44 }
  0xca   : > { %v364_v45 = vpop.permute.xlu1 %363  ;;  %v356_v46 = vpop.permute.xlu0 %355 }
  0xcb   : > { %382 = vst.msk [vmem:[#allocation2 + $0x30] sm:$0xff] %vm375_vm4, %v364_v45  ;;  %378 = vst.msk [vmem:[#allocation2 + $0x10] sm:$0xff] %vm375_vm4, %v356_v46 }
  0xce   : > { %v535_v47 = vpop.permute.xlu1 %534  ;;  %v527_v48 = vpop.permute.xlu0 %526 }
  0xcf   : > { %554 = vst.msk [vmem:[#allocation2 + $0x28] sm:$0xff] %vm548_vm7, %v535_v47  ;;  %550 = vst.msk [vmem:[#allocation2 + $0x8] sm:$0xff] %vm548_vm7, %v527_v48 }
  0xd2   : > { %v590_v49 = vpop.permute.xlu1 %589  ;;  %v582_v50 = vpop.permute.xlu0 %581 }
  0xd3   : > { %610 = vst.msk [vmem:[#allocation2 + $0x20] sm:$0xff] %vm605_vm8, %v590_v49  ;;  %606 = vst.msk [vmem:[#allocation2] sm:$0xff] %vm605_vm8, %v582_v50 }
  0xd6   : > { %v366_v51 = vpop.permute.xlu1 %365  ;;  %v358_v52 = vpop.permute.xlu0 %357 }
  0xd7   : > { %383 = vst.msk [vmem:[#allocation2 + $0x38] sm:$0xff] %vm375_vm4, %v366_v51  ;;  %379 = vst.msk [vmem:[#allocation2 + $0x18] sm:$0xff] %vm375_vm4, %v358_v52 }
  0xda   : > { %v421_v53 = vpop.permute.xlu1 %420  ;;  %v413_v54 = vpop.permute.xlu0 %412 }
  0xdb   : > { %439 = vst.msk [vmem:[#allocation2 + $0x30] sm:$0xff] %vm432_vm5, %v421_v53  ;;  %435 = vst.msk [vmem:[#allocation2 + $0x10] sm:$0xff] %vm432_vm5, %v413_v54 }
  0xde   : > { %v592_v55 = vpop.permute.xlu1 %591  ;;  %v584_v56 = vpop.permute.xlu0 %583 }
  0xdf   : > { %611 = vst.msk [vmem:[#allocation2 + $0x28] sm:$0xff] %vm605_vm8, %v592_v55  ;;  %607 = vst.msk [vmem:[#allocation2 + $0x8] sm:$0xff] %vm605_vm8, %v584_v56 }
  0xe2   : > { %v647_v57 = vpop.permute.xlu1 %646  ;;  %v639_v58 = vpop.permute.xlu0 %638 }
  0xe3   : > { %667 = vst.msk [vmem:[#allocation2 + $0x20] sm:$0xff] %vm662_vm9, %v647_v57  ;;  %663 = vst.msk [vmem:[#allocation2] sm:$0xff] %vm662_vm9, %v639_v58 }
  0xe6   : > { %v423_v59 = vpop.permute.xlu1 %422  ;;  %v415_v60 = vpop.permute.xlu0 %414 }
  0xe7   : > { %440 = vst.msk [vmem:[#allocation2 + $0x38] sm:$0xff] %vm432_vm5, %v423_v59  ;;  %436 = vst.msk [vmem:[#allocation2 + $0x18] sm:$0xff] %vm432_vm5, %v415_v60 }
  0xea   : > { %v478_v61 = vpop.permute.xlu1 %477  ;;  %v470_v62 = vpop.permute.xlu0 %469  ;;  %v671_v63 = vld [vmem:[#allocation2] sm:$0xff] }
  0xeb   : > { %v675_v0 = vld [vmem:[#allocation2 + $0x20] sm:$0xff]  ;;  %496 = vst.msk [vmem:[#allocation2 + $0x30] sm:$0xff] %vm489_vm6, %v478_v61  ;;  %492 = vst.msk [vmem:[#allocation2 + $0x10] sm:$0xff] %vm489_vm6, %v470_v62  ;;  %1095 = vmatprep.mubr.msk.f32.mxu0 %vm691_vm10, %v671_v63 }
  0xec   : > { %1101 = vmatprep.mubr.msk.f32.mxu1 %vm691_vm10, %v675_v0 }
  0xee   : > { %v649_v1 = vpop.permute.xlu1 %648  ;;  %v641_v2 = vpop.permute.xlu0 %640 }
  0xef   : > { %668 = vst.msk [vmem:[#allocation2 + $0x28] sm:$0xff] %vm662_vm9, %v649_v1  ;;  %664 = vst.msk [vmem:[#allocation2 + $0x8] sm:$0xff] %vm662_vm9, %v641_v2 }
  0xf2   : > { %v480_v3 = vpop.permute.xlu1 %479  ;;  %v472_v4 = vpop.permute.xlu0 %471 }
  0xf3   : > { %497 = vst.msk [vmem:[#allocation2 + $0x38] sm:$0xff] %vm489_vm6, %v480_v3  ;;  %493 = vst.msk [vmem:[#allocation2 + $0x18] sm:$0xff] %vm489_vm6, %v472_v4 }
  0xf6   : > { %v537_v5 = vpop.permute.xlu1 %536  ;;  %v529_v6 = vpop.permute.xlu0 %528  ;;  %v672_v7 = vld [vmem:[#allocation2 + $0x8] sm:$0xff] }
  0xf7   : > { %v676_v8 = vld [vmem:[#allocation2 + $0x28] sm:$0xff]  ;;  %555 = vst.msk [vmem:[#allocation2 + $0x30] sm:$0xff] %vm548_vm7, %v537_v5  ;;  %551 = vst.msk [vmem:[#allocation2 + $0x10] sm:$0xff] %vm548_vm7, %v529_v6  ;;  %1096 = vmatmul.mubr.msk.f32.vlgmr.msra.gmra.mrb[0].mxu0 %vm691_vm10, %v672_v7 }
  0xf8   : > { %1102 = vmatmul.mubr.msk.f32.vlgmr.msra.gmra.mrb[0].mxu1 %vm691_vm10, %v676_v8 }
  0xfa   : > { %v539_v9 = vpop.permute.xlu1 %538  ;;  %v531_v10 = vpop.permute.xlu0 %530 }
  0xfb   : > { %556 = vst.msk [vmem:[#allocation2 + $0x38] sm:$0xff] %vm548_vm7, %v539_v9  ;;  %552 = vst.msk [vmem:[#allocation2 + $0x18] sm:$0xff] %vm548_vm7, %v531_v10 }
  0xfe   : > { %v594_v11 = vpop.permute.xlu1 %593  ;;  %v586_v12 = vpop.permute.xlu0 %585 }
  0xff   : > { %612 = vst.msk [vmem:[#allocation2 + $0x30] sm:$0xff] %vm605_vm8, %v594_v11  ;;  %608 = vst.msk [vmem:[#allocation2 + $0x10] sm:$0xff] %vm605_vm8, %v586_v12 }
 0x102   : > { %v596_v13 = vpop.permute.xlu1 %595  ;;  %v588_v14 = vpop.permute.xlu0 %587 }
 0x103   : > { %613 = vst.msk [vmem:[#allocation2 + $0x38] sm:$0xff] %vm605_vm8, %v596_v13  ;;  %609 = vst.msk [vmem:[#allocation2 + $0x18] sm:$0xff] %vm605_vm8, %v588_v14 }
 0x106   : > { %v651_v15 = vpop.permute.xlu1 %650  ;;  %v643_v16 = vpop.permute.xlu0 %642 }
 0x107   : > { %669 = vst.msk [vmem:[#allocation2 + $0x30] sm:$0xff] %vm662_vm9, %v651_v15  ;;  %665 = vst.msk [vmem:[#allocation2 + $0x10] sm:$0xff] %vm662_vm9, %v643_v16 }
 0x10a   : > { %v653_v17 = vpop.permute.xlu1 %652  ;;  %v645_v18 = vpop.permute.xlu0 %644 }
 0x10b   : > { %670 = vst.msk [vmem:[#allocation2 + $0x38] sm:$0xff] %vm662_vm9, %v653_v17  ;;  %666 = vst.msk [vmem:[#allocation2 + $0x18] sm:$0xff] %vm662_vm9, %v645_v18 }
 0x10e   : > { %v673_v19 = vld [vmem:[#allocation2 + $0x10] sm:$0xff] }
 0x10f   : > { %v677_v20 = vld [vmem:[#allocation2 + $0x30] sm:$0xff]  ;;  %1098 = vmatprep.mubr.msk.f32.mxu0 %vm691_vm10, %v673_v19 }
 0x110   : > { %1104 = vmatprep.mubr.msk.f32.mxu1 %vm691_vm10, %v677_v20 }
 0x112   : > { %v674_v21 = vld [vmem:[#allocation2 + $0x18] sm:$0xff] }
 0x113   : > { %v678_v22 = vld [vmem:[#allocation2 + $0x38] sm:$0xff]  ;;  %1099 = vmatmul.mubr.msk.f32.gmra.mrb[2].mxu0 %vm691_vm10, %v674_v21 }
 0x114   : > { %1105 = vmatmul.mubr.msk.f32.gmra.mrb[2].mxu1 %vm691_vm10, %v678_v22 }
 0x1ca   : > { %v1097_v24 = vpop.f32.mrb[0].mxu0 }
 0x1cb   : > { %v1103_v25 = vpop.f32.mrb[0].mxu1  ;;  %v792_v26 = vadd.f32 %v1097_v24, %v1056_v23  ;;  %v786_v28 = vpop.f32.mrb[1].mxu0 }
 0x1cc   : > { %v812_v27 = vadd.f32 %v1103_v25, %v1056_v23  ;;  %v806_v29 = vpop.f32.mrb[1].mxu1  ;;  %v787_v30 = vadd.f32 %v1056_v23, %v786_v28 }
 0x1cd   : > { %v807_v31 = vadd.f32 %v1056_v23, %v806_v29  ;;  %826 = vst [vmem:[%s177_s10 + $0x8] sm:$0xff] %v792_v26 }
 0x1ce   : > { %830 = vst [vmem:[%s177_s10 + $0x28] sm:$0xff] %v812_v27  ;;  %825 = vst [vmem:[%s177_s10] sm:$0xff] %v787_v30 }
 0x1cf   : > { %829 = vst [vmem:[%s177_s10 + $0x20] sm:$0xff] %v807_v31 }
 0x1e6   : > { %v1100_v32 = vpop.f32.mrb[2].mxu0 }
 0x1e7   : > { %v1106_v33 = vpop.f32.mrb[2].mxu1  ;;  %v802_v34 = vadd.f32 %v1100_v32, %v1056_v23  ;;  %v796_v36 = vpop.f32.mrb[3].mxu0 }
 0x1e8   : > { %v822_v35 = vadd.f32 %v1106_v33, %v1056_v23  ;;  %v816_v37 = vpop.f32.mrb[3].mxu1  ;;  %v797_v38 = vadd.f32 %v1056_v23, %v796_v36 }
 0x1e9   : > { %v817_v39 = vadd.f32 %v1056_v23, %v816_v37  ;;  %828 = vst [vmem:[%s177_s10 + $0x18] sm:$0xff] %v802_v34 }
 0x1ea   : > { %832 = vst [vmem:[%s177_s10 + $0x38] sm:$0xff] %v822_v35  ;;  %827 = vst [vmem:[%s177_s10 + $0x10] sm:$0xff] %v797_v38 }
 0x1eb   : > { %831 = vst [vmem:[%s177_s10 + $0x30] sm:$0xff] %v817_v39 }
 0x1ec   : > { %1199 = shalt.err (!%p1196_p5)
}
 0x1ed   : > { %s1200_s4 = scalar_lea.hbm %s1599_s23, 1024  ;;  %s1204_s7 = scalar_lea.hbm %s1655_s3, 2048 }
 0x1ee   : > { %p1201_p6 = scmp.ne.s32.totalorder %s1599_s23, %s1200_s4  ;;  %p1205_p10 = scmp.lt.u32.totalorder %s1599_s23, %s1655_s3 }
 0x1ef   : > { %p1206_p11 = scmp.lt.u32.totalorder %s1204_s7, %s1200_s4  ;;  %p1208_p13 = scmp.lt.u32.totalorder %s1200_s4, %s1599_s23 }
 0x1f0   : > { %p1202_p7 = pnand %p1201_p6, %p1336_p4 }
 0x1f1   : > { %p1207_p12 = por %p1206_p11, %p1205_p10 }
 0x1f2   : > { %p1203_p9 = pneg %p1202_p7 }
 0x1f3   : > { %p1209_p0 = por %p1208_p13, %p1207_p12 }
 0x1f5   : > { %p1210_p1 = pnand %p1209_p0, %p1203_p9 }
 0x1f7   : > { %1213 = shalt.err (!%p1210_p1)
}
 0x1f8   : > { %s1275_s10 = smov 128  }
 0x1f9   : > { %1122 = dma.vmem_to_hbm [thread:$0]  (%p1336_p4), %s1601_s18, 1024, %s1599_s23, %s1605_s15, %s1275_s10, %s1275_s10, %s1267_s5  }
 0x1fa PF: > { %p1128_p2 = scmp.ge.s32.totalorder %s1264_s17, 2  ;;  %s864_s11 = sand.u32 1, %s1244_s12  }
 0x1fb   : > { %s865_s19 = scalar_lea.sflag [#allocation4], %s864_s11 }
 0x1fc   : > { %p1125_p3 = pnand %p1128_p2, %p1343_p8 }
 0x1fe   : > { %1239 = dma.done.wait (!%p1125_p3), %s865_s19, 1024  }
 0x1ff   : > { %1241 = vsyncadd (!%p1125_p3), %s865_s19, 4294966272  ;;  %s16_s17 = sadd.s32 1, %s1264_s17   ;;  %s1658_s12 = smov %s1248_s13 }
 0x200   : > { %p13_p5 = scmp.ge.s32.totalorder %s16_s17, 4   ;;  %s1659_s13 = smov %s1252_s14 }
 0x201   : > { %s1660_s14 = smov %s1349_s25  ;;  %s1661_s15 = smov %s1260_s16 }
 0x202   : > { %s1662_s16 = smov %s1664_s20  ;;  %15 = sbr.rel (!%p13_p5) target bundleno = 4 (0x4), region = 139 }
 0x209   :  { %870 = vsyncpa [#allocation4], 1 }
 0x20a   :  { %872 = vsyncpa [#allocation4 + $0x1], 1 }

</bundles_post_ra>
